<compile_context>
chip_gen: v6e
topology: v6e:2x2x1
jax: 0.10.0
libtpu: 0.0.40
codegen_flags: <defaults>
</compile_context>

<pallas_src>
import functools

import jax
import jax.numpy as jnp
from jax import lax
from jax.experimental import pallas as pl
from jax.experimental.pallas import tpu as pltpu


# --------------------------------------------------------------------------------------
# Helpers
# --------------------------------------------------------------------------------------

def _sublane_multiple(dtype) -> int:
    """Sublane packing multiple for block shapes: 8 (f32), 16 (bf16/f16), 32 (int8/fp8)."""
    return max(8, 32 // jnp.dtype(dtype).itemsize)


def _band_rows(n_ctx: int, seq_len: int, dtype) -> int:
    """Rows [0, band) of the sequence axis rewritten each forward (sublane-rounded)."""
    sub = _sublane_multiple(dtype)
    band = -(-(1 + n_ctx) // sub) * sub
    return int(min(band, seq_len))


def _vmem_capacity_bytes() -> int:
    try:
        info = pltpu.get_tpu_info()
        cap = getattr(info, "vmem_capacity_bytes", None)
        if cap:
            return int(cap)
    except Exception:
        pass
    return 64 << 20  # conservative fallback (v7x per-TensorCore VMEM)


def _pick_class_block(n_cls: int, per_class_bytes: int, shared_bytes: int,
                      vmem_capacity: int) -> int:
    """Largest class batch whose double-buffered working set fits ~1/3 of physical VMEM,
    while keeping >= 4 (preferably even) grid steps for v7x's two TensorCores."""
    budget = max(vmem_capacity // 3, 8 << 20)
    avail = max((budget - 2 * shared_bytes) // 2, per_class_bytes)
    c_blk = max(1, avail // per_class_bytes)
    if n_cls >= 4:
        c_blk = min(c_blk, pl.cdiv(n_cls, 4))
    elif n_cls >= 2:
        c_blk = min(c_blk, pl.cdiv(n_cls, 2))
    c_blk = int(min(c_blk, n_cls))
    # Best-effort nudge to an even step count (balanced 2-TC split on v7x).
    steps = pl.cdiv(n_cls, c_blk)
    if steps > 1 and steps % 2 == 1:
        c_blk = int(max(1, pl.cdiv(n_cls, steps + 1)))
    return c_blk


# --------------------------------------------------------------------------------------
# Kernel
# --------------------------------------------------------------------------------------

def _prompt_band_kernel(*refs, n_ctx: int, has_suffix_head: bool):
    """Rewrites rows [0, band) of the aliased prompts buffer for one class batch."""
    if has_suffix_head:
        base_ref, prefix_ref, suffix_head_ref, ctx_ref, out_ref = refs
    else:
        base_ref, prefix_ref, ctx_ref, out_ref = refs
        suffix_head_ref = None
    del base_ref  # persistent prompts buffer: aliased to the output, never read in-kernel.

    c_blk, band, _ = out_ref.shape
    out_dtype = out_ref.dtype

    # Row 0: the frozen SOS/prefix row.
    out_ref[:, 0:1, :] = prefix_ref[...].astype(out_dtype)

    # Rows 1+n_ctx .. band: frozen suffix rows that fall inside the sublane-rounded band.
    # Everything at/after `band` is never touched and is preserved by the alias.
    if suffix_head_ref is not None:
        out_ref[:, 1 + n_ctx:band, :] = suffix_head_ref[...].astype(out_dtype)

    # Rows 1 .. 1+n_ctx: the learnable shared context. Per-class stores avoid a
    # (c_blk, n_ctx, D) broadcast temporary; the kernel is DMA-bound so the loop is free.
    ctx = ctx_ref[...].astype(out_dtype)

    def _write_ctx(c, carry):
        out_ref[c, 1:1 + n_ctx, :] = ctx
        return carry

    lax.fori_loop(0, c_blk, _write_ctx, 0)


# --------------------------------------------------------------------------------------
# One-time "registration" (analogue of BasePromptLearner.registration / init_embedding)
# --------------------------------------------------------------------------------------

def make_prompt_buffers(embedding, n_ctx):
    """Slice the frozen buffers once. `embedding` (n_cls, S, D) is the frozen token
    embedding of the tokenized prompts; it doubles as the persistent prompts buffer
    (its ctx band holds the placeholder-'X' embeddings that forward() overwrites).

    Returns (prompts_base, token_prefix, suffix_head):
      prompts_base : (n_cls, S, D)        — pass to forward(), donate for best perf.
      token_prefix : (n_cls, 1, D)        — embedding[:, :1, :]
      suffix_head  : (n_cls, overlap, D)  — embedding[:, 1+n_ctx:band, :], or None.
    """
    n_cls, seq_len, _ = embedding.shape
    band = _band_rows(n_ctx, seq_len, embedding.dtype)
    overlap = band - (1 + n_ctx)
    token_prefix = embedding[:, :1, :]
    suffix_head = embedding[:, 1 + n_ctx:band, :] if overlap > 0 else None
    return embedding, token_prefix, suffix_head


# --------------------------------------------------------------------------------------
# Forward
# --------------------------------------------------------------------------------------

def vl_prompt_learner_forward(ctx, prompts_base, token_prefix, suffix_head=None):
    """VLPromptLearner.forward() (class_token_position='end', label=None).

    Returns prompts (n_cls, S, D) == concat([prefix, broadcast(ctx), suffix], axis=1),
    produced by rewriting only the ctx band of the aliased `prompts_base` buffer.
    Note: ctx is down-cast to the frozen-embedding dtype if it is higher precision.
    """
    n_ctx, d = ctx.shape
    n_cls, seq_len, d_b = prompts_base.shape
    if d_b != d or token_prefix.shape != (n_cls, 1, d):
        raise ValueError("inconsistent ctx / prompts_base / token_prefix shapes")

    out_dtype = prompts_base.dtype
    band = _band_rows(n_ctx, seq_len, out_dtype)
    overlap = band - (1 + n_ctx)
    if overlap > 0 and (suffix_head is None or suffix_head.shape != (n_cls, overlap, d)):
        raise ValueError("suffix_head must be embedding[:, 1+n_ctx:band, :]; "
                         "build the buffers once with make_prompt_buffers().")

    o_item = jnp.dtype(out_dtype).itemsize
    p_item = jnp.dtype(token_prefix.dtype).itemsize
    s_item = jnp.dtype(suffix_head.dtype).itemsize if overlap > 0 else 0
    c_item = jnp.dtype(ctx.dtype).itemsize

    per_class_bytes = d * (1 * p_item + overlap * s_item + band * o_item)
    shared_bytes = n_ctx * d * c_item
    vmem_capacity = _vmem_capacity_bytes()
    c_blk = _pick_class_block(n_cls, per_class_bytes, shared_bytes, vmem_capacity)

    working_set = 2 * c_blk * per_class_bytes + 2 * shared_bytes
    cap_hi = max(int(vmem_capacity * 0.8), 32 << 20)
    vmem_limit = int(min(max(working_set * 5 // 4, 16 << 20), cap_hi))

    # Pure data movement: flops = 0; bytes = small frozen reads + ctx + band writeback.
    bytes_read = n_cls * d * (1 * p_item + overlap * s_item) + n_ctx * d * c_item
    bytes_written = n_cls * band * d * o_item
    cost = pl.CostEstimate(flops=0, transcendentals=0,
                           bytes_accessed=bytes_read + bytes_written)

    base_spec = pl.BlockSpec(memory_space=pl.ANY)  # aliased persistent buffer; never read
    prefix_spec = pl.BlockSpec((c_blk, 1, d), lambda i: (i, 0, 0))
    ctx_spec = pl.BlockSpec((n_ctx, d), lambda i: (0, 0))
    out_spec = pl.BlockSpec((c_blk, band, d), lambda i: (i, 0, 0))

    if overlap > 0:
        in_specs = [base_spec, prefix_spec,
                    pl.BlockSpec((c_blk, overlap, d), lambda i: (i, 0, 0)),
                    ctx_spec]
        args = (prompts_base, token_prefix, suffix_head, ctx)
    else:
        in_specs = [base_spec, prefix_spec, ctx_spec]
        args = (prompts_base, token_prefix, ctx)

    kernel = functools.partial(_prompt_band_kernel, n_ctx=n_ctx,
                               has_suffix_head=overlap > 0)

    return pl.pallas_call(
        kernel,
        out_shape=jax.ShapeDtypeStruct((n_cls, seq_len, d), out_dtype),
        grid_spec=pltpu.PrefetchScalarGridSpec(
            num_scalar_prefetch=0,
            grid=(pl.cdiv(n_cls, c_blk),),
            in_specs=in_specs,
            out_specs=out_spec,
        ),
        input_output_aliases={0: 0},
        compiler_params=pltpu.CompilerParams(
            dimension_semantics=("parallel",),
            vmem_limit_bytes=vmem_limit,
        ),
        cost_estimate=cost,
    )(*args)


# --------------------------------------------------------------------------------------
# Reference + tests
# --------------------------------------------------------------------------------------

def _reference(ctx, embedding, n_ctx):
    n_cls = embedding.shape[0]
    prefix = embedding[:, :1, :]
    suffix = embedding[:, 1 + n_ctx:, :]
    ctx_b = jnp.broadcast_to(ctx[None].astype(embedding.dtype),
                             (n_cls, n_ctx, ctx.shape[-1]))
    return jnp.concatenate([prefix, ctx_b, suffix], axis=1)


if __name__ == "__main__":
    # Small shapes consistent with the module: n_cls classes, n_ctx context tokens,
    # D = ctx_dim, seq_len total tokens (real CLIP: S=77, D=512, n_ctx=16).
    n_cls, n_ctx, D, seq_len = 8, 4, 128, 16
    dtype = jnp.float32

    key = jax.random.PRNGKey(0)
    k_ctx, k_emb = jax.random.split(key)

    # nn.init.normal_(ctx_vectors, std=0.02)  (VLPromptLearner.init_prompt, generic branch)
    ctx = (0.02 * jax.random.normal(k_ctx, (n_ctx, D))).astype(dtype)

    # TODO(synk): the real module computes `embedding` via CLIP tokenizer + frozen
    # token_embedding on the host; a deterministic random stand-in is used here.
    embedding = jax.random.normal(k_emb, (n_cls, seq_len, D)).astype(dtype)

    prompts_base, token_prefix, suffix_head = make_prompt_buffers(embedding, n_ctx)
    ref = _reference(ctx, embedding, n_ctx)

    # 1) Production path: jit + donated persistent buffer -> the kernel only rewrites the
    #    sublane-rounded ctx band; the rest of the buffer is reused in place via the alias.
    fwd = jax.jit(vl_prompt_learner_forward, donate_argnums=(1,))
    prompts = jax.block_until_ready(
        fwd(ctx, jnp.copy(prompts_base), token_prefix, suffix_head))
    assert prompts.shape == (n_cls, seq_len, D) and prompts.dtype == dtype
    assert bool(jnp.allclose(prompts, ref)), "mismatch vs reference (jit + donation)"

    # 2) Eager / non-donating call (XLA inserts a defensive copy; correctness identical).
    prompts2 = jax.block_until_ready(
        vl_prompt_learner_forward(ctx, prompts_base, token_prefix, suffix_head))
    assert bool(jnp.allclose(prompts2, ref)), "mismatch vs reference (eager)"

    # 3) Mixed dtype (real CLIP case): bf16 frozen embedding + f32 learnable ctx.
    emb_bf = embedding.astype(jnp.bfloat16)
    base_bf, pre_bf, sufh_bf = make_prompt_buffers(emb_bf, n_ctx)
    p_bf = jax.block_until_ready(vl_prompt_learner_forward(ctx, base_bf, pre_bf, sufh_bf))
    assert p_bf.dtype == jnp.bfloat16
    assert bool(jnp.allclose(p_bf.astype(jnp.float32),
                             _reference(ctx, emb_bf, n_ctx).astype(jnp.float32))), \
        "mismatch vs reference (bf16 embedding)"

    # 4) Ragged class count (n_cls not a multiple of the class block): masked edge block.
    n_cls2 = 5
    emb2 = jax.random.normal(jax.random.PRNGKey(1), (n_cls2, seq_len, D)).astype(dtype)
    base2, pre2, sufh2 = make_prompt_buffers(emb2, n_ctx)
    p2 = jax.block_until_ready(vl_prompt_learner_forward(ctx, base2, pre2, sufh2))
    assert bool(jnp.allclose(p2, _reference(ctx, emb2, n_ctx))), \
        "mismatch vs reference (ragged n_cls)"

    # 5) Band exactly 1+n_ctx (no suffix overlap inside the band): n_ctx = 7 -> band = 8.
    ctx7 = (0.02 * jax.random.normal(jax.random.PRNGKey(2), (7, D))).astype(dtype)
    base7, pre7, sufh7 = make_prompt_buffers(embedding, 7)
    assert sufh7 is None
    p7 = jax.block_until_ready(vl_prompt_learner_forward(ctx7, base7, pre7, sufh7))
    assert bool(jnp.allclose(p7, _reference(ctx7, embedding, 7))), \
        "mismatch vs reference (no suffix overlap)"

    print("KERNEL_OK")
</pallas_src>

<mosaic_0001>
module attributes {stable_mosaic.version = 11 : i64} {
  func.func @_prompt_band_kernel(%arg0: i32, %arg1: memref<8x16x128xf32, #tpu.memory_space<any>>, %arg2: memref<2x1x128xf32, #tpu.memory_space<vmem>>, %arg3: memref<2x3x128xf32, #tpu.memory_space<vmem>>, %arg4: memref<4x128xf32, #tpu.memory_space<vmem>>, %arg5: memref<2x8x128xf32, #tpu.memory_space<vmem>>) attributes {dimension_semantics = [#tpu.dimension_semantics<parallel>], iteration_bounds = array<i64: 4>, scalar_prefetch = 0 : i64, scratch_operands = 0 : i64, tpu.core_type = #tpu.core_type<tc>, window_params = [{}, {transform_indices = @transform_1, window_bounds = array<i64: 2, 1, 128>}, {transform_indices = @transform_2, window_bounds = array<i64: 2, 3, 128>}, {pipeline_mode = #tpu.pipeline_mode<synchronous>, transform_indices = @transform_3, window_bounds = array<i64: 4, 128>}, {transform_indices = @transform_4, window_bounds = array<i64: 2, 8, 128>}]} {
    %c0 = arith.constant 0 : index
    %c0_0 = arith.constant 0 : index
    %c0_1 = arith.constant 0 : index
    %0 = vector.load %arg2[%c0, %c0_0, %c0_1] : memref<2x1x128xf32, #tpu.memory_space<vmem>>, vector<2x1x128xf32>
    %c0_2 = arith.constant 0 : index
    %c0_3 = arith.constant 0 : index
    %c0_4 = arith.constant 0 : index
    %1 = vector.load %arg5[%c0_2, %c0_3, %c0_4] : memref<2x8x128xf32, #tpu.memory_space<vmem>>, vector<2x1x128xf32>
    tpu.vector_store %arg5[%c0_2, %c0_3, %c0_4], %0 {strides = array<i32>} : memref<2x8x128xf32, #tpu.memory_space<vmem>>, vector<2x1x128xf32>,
    %c0_5 = arith.constant 0 : index
    %c0_6 = arith.constant 0 : index
    %c0_7 = arith.constant 0 : index
    %2 = vector.load %arg3[%c0_5, %c0_6, %c0_7] : memref<2x3x128xf32, #tpu.memory_space<vmem>>, vector<2x3x128xf32>
    %c0_8 = arith.constant 0 : index
    %c5 = arith.constant 5 : index
    %c0_9 = arith.constant 0 : index
    %3 = vector.load %arg5[%c0_8, %c5, %c0_9] : memref<2x8x128xf32, #tpu.memory_space<vmem>>, vector<2x3x128xf32>
    tpu.vector_store %arg5[%c0_8, %c5, %c0_9], %2 {strides = array<i32>} : memref<2x8x128xf32, #tpu.memory_space<vmem>>, vector<2x3x128xf32>,
    %c0_10 = arith.constant 0 : index
    %c0_11 = arith.constant 0 : index
    %4 = vector.load %arg4[%c0_10, %c0_11] : memref<4x128xf32, #tpu.memory_space<vmem>>, vector<4x128xf32>
    %c0_i32 = arith.constant 0 : i32
    %c2_i32 = arith.constant 2 : i32
    %5 = arith.addi %c0_i32, %c2_i32 : i32
    %c1_i32 = arith.constant 1 : i32
    scf.for %arg6 = %c0_i32 to %5 step %c1_i32  : i32 {
      %6 = arith.index_cast %arg6 : i32 to index
      %c1 = arith.constant 1 : index
      %c0_13 = arith.constant 0 : index
      %7 = vector.load %arg5[%6, %c1, %c0_13] : memref<2x8x128xf32, #tpu.memory_space<vmem>>, vector<1x4x128xf32>
      %8 = vector.shape_cast %7 : vector<1x4x128xf32> to vector<4x128xf32>
      %9 = vector.shape_cast %4 : vector<4x128xf32> to vector<1x4x128xf32>
      tpu.vector_store %arg5[%6, %c1, %c0_13], %9 {strides = array<i32>} : memref<2x8x128xf32, #tpu.memory_space<vmem>>, vector<1x4x128xf32>,
    }
    %c2_i32_12 = arith.constant 2 : i32
    return
  }
  func.func @transform_1(%arg0: i32) -> (i32, i32, i32) {
    %c0_i32 = arith.constant 0 : i32
    %c0_i32_0 = arith.constant 0 : i32
    %c0_i32_1 = arith.constant 0 : i32
    return %arg0, %c0_i32, %c0_i32_0 : i32, i32, i32
  }
  func.func @transform_2(%arg0: i32) -> (i32, i32, i32) {
    %c0_i32 = arith.constant 0 : i32
    %c0_i32_0 = arith.constant 0 : i32
    %c0_i32_1 = arith.constant 0 : i32
    return %arg0, %c0_i32, %c0_i32_0 : i32, i32, i32
  }
  func.func @transform_3(%arg0: i32) -> (i32, i32) {
    %c0_i32 = arith.constant 0 : i32
    %c0_i32_0 = arith.constant 0 : i32
    %c0_i32_1 = arith.constant 0 : i32
    return %c0_i32, %c0_i32_0 : i32, i32
  }
  func.func @transform_4(%arg0: i32) -> (i32, i32, i32) {
    %c0_i32 = arith.constant 0 : i32
    %c0_i32_0 = arith.constant 0 : i32
    %c0_i32_1 = arith.constant 0 : i32
    return %arg0, %c0_i32, %c0_i32_0 : i32, i32, i32
  }
}

</mosaic_0001>

<bundles_post_ra>
// kernel: vl_prompt_learner_forward.1
= control target key start
LH: loop header
LB: loop body
LE: loop exit
PB: predicated region body
PF: predicated region fallthrough
CT: control target
= control target key end

     0   :  { %9 = vsyncpa [#allocation3], 0  ;;  %s580_s0 = inlined_call_operand.hbm [shape: f32[8,16,128], index: 0, kind: input, shape index: {}, may-alias: {0,4}]   ;;  %s581_s1 = inlined_call_operand.vmem [shape: f32[8,1,128], index: 1, kind: input, shape index: {}]   ;;  %s582_s2 = inlined_call_operand.vmem [shape: f32[8,3,128], index: 2, kind: input, shape index: {}]   ;;  %s583_s3 = inlined_call_operand.vmem [shape: f32[4,128], index: 3, kind: input, shape index: {}]   ;;  %s584_s4 = inlined_call_operand.hbm [shape: f32[8,16,128], index: 4, kind: output, shape index: {}, may-alias: {0,4}]  }
   0x1   :  { %11 = vsyncpa [#allocation3 + $0x1], 0  ;;  %s469_s15 = smov 0   ;;  %s471_s16 = smov 0  }
   0x2   :  { %s473_s17 = smov 0   ;;  %s475_s0 = smov 0  }
   0x3 LB: > { %s490_s18 = sadd.s32 4294967295, %s434_s0   ;;  %s303_s19 = sadd.s32 4294967294, %s434_s0   ;;  %s434_s0 = sphi %s475_s0, %s590_s0   ;;  %s430_s17 = sphi %s473_s17, %s589_s17   ;;  %s426_s16 = sphi %s471_s16, %s588_s16   ;;  %s422_s15 = sphi %s469_s15, %s587_s15  }
   0x4   : > { %s494_s20 = sadd.s32 1, %s434_s0   ;;  %s97_s21 = sadd.s32 1, %s430_s17 }
   0x5   : > { %s94_s22 = ssub.s32 %s434_s0, %s494_s20  ;;  %p107_p0 = scmp.ne.s32.totalorder %s430_s17, %s426_s16 }
   0x6   : > { %p95_p1 = scmp.eq.s32.totalorder %s94_s22, 0  ;;  %p108_p2 = scmp.eq.s32.totalorder %s490_s18, 3 }
   0x7   : > { %p113_p3 = scmp.ne.s32.totalorder %s426_s16, %s422_s15  ;;  %p114_p4 = scmp.eq.s32.totalorder %s303_s19, 3 }
   0x8   : > { %s505_s23 = scalar_select %p95_p1, %s430_s17, %s97_s21  }
   0x9   : > { %p507_p5 = por %p108_p2, %p107_p0  ;;  %p511_p6 = por %p114_p4, %p113_p3 }
   0xa   : > { %p306_p7 = scmp.ge.s32.totalorder %s434_s0, 1  ;;  %p152_p8 = scmp.lt.s32.totalorder %s434_s0, 5 }
   0xc   : > { %p153_p9 = pnand %p306_p7, %p152_p8 }
   0xd   : > { %s177_s26 = sand.u32 (!%p153_p9), 1, %s426_s16   ;;  %s308_s27 = sshll.u32 (!%p153_p9), %s490_s18, 1 }
   0xe   : > { %156 = sbr.rel (%p153_p9) target bundleno = 53 (0x35), region = 32  ;;  %s307_s30 = sshll.u32 (!%p153_p9), %s177_s26, 4 }
   0xf   : > { %p181_p10 = scmp.lt.s32.totalorder (!%p153_p9), %s308_s27, 7  ;;  %s179_s12 = scalar_lea.vmem (!%p153_p9), [#allocation2], %s307_s30 }
  0x10   : > { %s436_s13 = smov (!%p153_p9), 0  }
  0x13   : > { %v200_v0 = vld [vmem:[%s583_s3] sm:$0xf]  ;;  %s592_s27 = smov (!%p181_p10, %s308_s27), 7 }
  0x14   : > { %s183_s7 = scalar_lea.vmem %s581_s1, %s592_s27  ;;  %s310_s8 = sshll.u32 %s592_s27, 2 }
  0x15   : > { %v192_v1 = vld [vmem:[%s183_s7] sm:$0x1]  ;;  %v193_v2 = vld [vmem:[%s183_s7 + $0x1] sm:$0x1]  ;;  %s189_s11 = scalar_lea.vmem %s582_s2, %s310_s8 }
  0x16   : > { %194 = vst [vmem:[%s179_s12] sm:$0x1] %v192_v1  ;;  %195 = vst [vmem:[%s179_s12 + $0x8] sm:$0x1] %v193_v2  ;;  %v196_v3 = vld [vmem:[%s189_s11] sm:$0x7] }
  0x17   : > { %v197_v4 = vld [vmem:[%s189_s11 + $0x4] sm:$0x7]  ;;  %198 = vst [vmem:[%s179_s12 + $0x5] sm:$0x7] %v196_v3 }
  0x18   : > { %199 = vst [vmem:[%s179_s12 + $0xd] sm:$0x7] %v197_v4 }
  0x19 LB: >> { %s311_s14 = sshll.u32 %s438_s13, 3  ;;  %s206_s13 = sadd.s32 1, %s438_s13   ;;  %s438_s13 = sphi %s436_s13, %s206_s13  }
  0x1a   : >> { %s208_s19 = scalar_lea.vmem %s179_s12, %s311_s14 [#allocation2]  ;;  %p203_p11 = scmp.ge.s32.totalorder %s206_s13, 2  }
  0x1b   : >> { %209 = vst [vmem:[%s208_s19 + $0x1] sm:$0xf] %v200_v0  ;;  %s319_s21 = sshll.u32 (%p203_p11), %s490_s18, 9  ;;  %s225_s29 = sshll.u32 (%p203_p11), %s179_s12, 4  ;;  %s536_s29 = int_to_ptr.vmem [resolvable:$true] %s225_s29 }
  0x1c   : > { %205 = sbr.rel (!%p203_p11) target bundleno = 25 (0x19), region = 78  ;;  %s534_s28 = scalar_lea.hbm (%p203_p11), %s584_s4, %s319_s21 }
  0x1d   : > { %s540_s30 = scalar_lea.sflag (%p203_p11), [#allocation3], %s177_s26  ;;  %s370_s5 = scalar_lea.vmem (%p203_p11), %s536_s29, 256 }
  0x1e   : > { %p371_p12 = scmp.ne.s32.totalorder (%p203_p11), %s536_s29, %s370_s5  ;;  %s440_s18 = smov (%p203_p11), [#allocation2]  }
  0x1f   : > { %s374_s6 = sshll.u32 (%p203_p11), %s440_s18, 4  ;;  %s375_s6 = int_to_ptr.vmem [resolvable:$false] %s374_s6 }
  0x20   : > { %p372_p13 = pnand (%p203_p11), %p371_p12, %p507_p5  ;;  %s376_s7 = scalar_lea.vmem (%p203_p11), %s375_s6, 512 }
  0x21   : > { %p377_p1 = scmp.lt.s32.totalorder %s536_s29, %s375_s6  ;;  %p378_p2 = scmp.lt.s32.totalorder %s376_s7, %s370_s5 }
  0x22   : > { %p373_p0 = pneg %p372_p13 }
  0x23   : > { %p379_p3 = por %p378_p2, %p377_p1 }
  0x25   : > { %p380_p4 = pnand %p379_p3, %p373_p0 }
  0x27   : > { %383 = shalt.err (!%p380_p4)
}
  0x28   : > { %s384_s26 = scalar_lea.hbm %s534_s28, 256  ;;  %s388_s10 = scalar_lea.hbm %s584_s4, 2048 }
  0x29   : > { %p385_p7 = scmp.ne.s32.totalorder %s534_s28, %s384_s26  ;;  %p389_p10 = scmp.lt.s32.totalorder %s534_s28, %s584_s4 }
  0x2a   : > { %p390_p11 = scmp.lt.s32.totalorder %s388_s10, %s384_s26 }
  0x2b   : > { %p386_p8 = pnand %p385_p7, %p507_p5 }
  0x2c   : > { %p391_p12 = por %p390_p11, %p389_p10 }
  0x2d   : > { %p387_p9 = pneg %p386_p8 }
  0x2f   : > { %p392_p13 = pnand %p391_p12, %p387_p9 }
  0x31   : > { %395 = shalt.err (!%p392_p13)
}
  0x32   : > { %s441_s13 = smov 128   ;;  %s442_s14 = smov 256  }
  0x33   : > { %s443_s19 = smov 8  }
  0x34   : > { %320 = dma.vmem_to_hbm [thread:$0]  (%p507_p5), %s536_s29, 256, %s534_s28, %s540_s30, %s441_s13, %s442_s14, %s443_s19  }
  0x35 PF: > { %p326_p0 = scmp.ge.s32.totalorder %s434_s0, 2  ;;  %s240_s21 = sand.u32 1, %s422_s15  }
  0x36   : > { %s241_s22 = scalar_lea.sflag [#allocation3], %s240_s21 }
  0x37   : > { %p323_p1 = pnand %p326_p0, %p511_p6 }
  0x39   : > { %p324_p2 = pneg %p323_p1 }
  0x3b   : > { %417 = dma.done.wait (%p324_p2), %s241_s22, 256  }
  0x3c   : > { %419 = vsyncadd (%p324_p2), %s241_s22, 4294967040  ;;  %p14_p3 = scmp.ge.s32.totalorder %s494_s20, 6   ;;  %s587_s15 = smov %s426_s16 }
  0x3d   : > { %s588_s16 = smov %s430_s17  ;;  %s589_s17 = smov %s505_s23 }
  0x3e   : > { %s590_s0 = smov %s494_s20  ;;  %16 = sbr.rel (!%p14_p3) target bundleno = 3 (0x3), region = 89 }
  0x43   :  { %246 = vsyncpa [#allocation3], 1 }
  0x44   :  { %248 = vsyncpa [#allocation3 + $0x1], 1 }

</bundles_post_ra>
